<compile_context>
chip_gen: v7x
topology: tpu7x:2x2x1
jax: 0.10.0
libtpu: 0.0.40
codegen_flags: <defaults>
</compile_context>

<pallas_src>
import jax
import jax.numpy as jnp
from jax import lax
from jax.experimental import pallas as pl
from jax.experimental.pallas import tpu as pltpu

_EPS = 1e-5  # nn.LayerNorm default eps


# ----------------------------------------------------------------------------
# Pallas kernel: fused LayerNorm(4C) + Linear(4C -> C, no bias)
# ----------------------------------------------------------------------------
def _norm_reduce_kernel(x_ref, g_ref, b_ref, w_ref, o_ref):
    # x_ref: (TL, 4C) bf16 | g_ref, b_ref: (1, 4C) f32 | w_ref: (4C, C) bf16
    # o_ref: (TL, C) f32
    x = x_ref[...].astype(jnp.float32)                       # (TL, 4C)
    mean = jnp.mean(x, axis=-1, keepdims=True)
    xc = x - mean
    var = jnp.mean(xc * xc, axis=-1, keepdims=True)          # biased var (LayerNorm)
    xn = xc * lax.rsqrt(var + _EPS) * g_ref[...] + b_ref[...]
    # bf16 MXU matmul, f32 accumulation.
    y = jnp.dot(xn.astype(jnp.bfloat16), w_ref[...],
                preferred_element_type=jnp.float32)           # (TL, C)
    o_ref[...] = y.astype(o_ref.dtype)


def _pick_row_tile(n, target=1024):
    """Largest multiple-of-8 divisor of n that is <= target (else n itself)."""
    if n <= target:
        return n
    t = (target // 8) * 8
    while t >= 8:
        if n % t == 0:
            return t
        t -= 8
    return n  # fallback: full extent (always a legal block shape)


def _norm_reduce_pallas(merged, gamma, beta, w_t, out_dtype):
    n, c4 = merged.shape
    c = w_t.shape[1]
    tl = _pick_row_tile(n)
    grid = (pl.cdiv(n, tl),)
    return pl.pallas_call(
        _norm_reduce_kernel,
        out_shape=jax.ShapeDtypeStruct((n, c), out_dtype),
        grid_spec=pltpu.PrefetchScalarGridSpec(
            num_scalar_prefetch=0,
            grid=grid,
            in_specs=[
                pl.BlockSpec((tl, c4), lambda i: (i, 0)),   # merged rows tile
                pl.BlockSpec((1, c4), lambda i: (0, 0)),    # LayerNorm gamma
                pl.BlockSpec((1, c4), lambda i: (0, 0)),    # LayerNorm beta
                pl.BlockSpec((c4, c), lambda i: (0, 0)),    # reduction weight (4C, C)
            ],
            out_specs=pl.BlockSpec((tl, c), lambda i: (i, 0)),
        ),
        compiler_params=pltpu.CompilerParams(
            dimension_semantics=("parallel",)),
    )(merged, gamma, beta, w_t)


# ----------------------------------------------------------------------------
# full forward: glue (patch merge) + fused kernel
# ----------------------------------------------------------------------------
def first_patch_merging_forward(x, params):
    """x: (B, C, H, W) -> (B, dim, H//2, W//2)."""
    B, C, H, W = x.shape
    assert H % 2 == 0 and W % 2 == 0, f"x size ({H}*{W}) are not even."
    dim = params["w_t"].shape[1]

    # NCHW -> NHWC -> 2x2 neighborhood concat in PyTorch's [x0, x1, x2, x3]
    # order (4C group index g = 2*col_parity + row_parity).  XLA fuses the
    # transpose chain + bf16 cast into a single copy pass.
    xh = jnp.transpose(x, (0, 2, 3, 1))                       # (B, H, W, C)
    xh = xh.reshape(B, H // 2, 2, W // 2, 2, C)               # (b, hh, rp, ww, cp, c)
    merged = jnp.transpose(xh, (0, 1, 3, 4, 2, 5))            # (b, hh, ww, cp, rp, c)
    n_rows = B * (H // 2) * (W // 2)
    merged = merged.reshape(n_rows, 4 * C).astype(jnp.bfloat16)

    y = _norm_reduce_pallas(merged, params["gamma"], params["beta"],
                            params["w_t"], x.dtype)           # (N, dim)
    y = y.reshape(B, H // 2, W // 2, dim)
    return jnp.transpose(y, (0, 3, 1, 2))                     # (B, dim, H/2, W/2)


# ----------------------------------------------------------------------------
# pure-JAX f32 reference (mirrors the PyTorch module exactly)
# ----------------------------------------------------------------------------
def first_patch_merging_reference(x, gamma, beta, w):
    B, C, H, W = x.shape
    xh = jnp.transpose(x, (0, 2, 3, 1))
    x0 = xh[:, 0::2, 0::2, :]
    x1 = xh[:, 1::2, 0::2, :]
    x2 = xh[:, 0::2, 1::2, :]
    x3 = xh[:, 1::2, 1::2, :]
    m = jnp.concatenate([x0, x1, x2, x3], axis=-1).reshape(B, -1, 4 * C)
    mean = jnp.mean(m, axis=-1, keepdims=True)
    var = jnp.mean((m - mean) ** 2, axis=-1, keepdims=True)
    xn = (m - mean) / jnp.sqrt(var + _EPS) * gamma + beta
    y = xn @ w.T                                              # Linear(4C, dim), no bias
    dim = w.shape[0]
    y = y.reshape(B, H // 2, W // 2, dim)
    return jnp.transpose(y, (0, 3, 1, 2))


# ----------------------------------------------------------------------------
# deterministic parameter init (shapes from the module __init__)
# ----------------------------------------------------------------------------
def init_params(key, dim):
    k1, k2, k3 = jax.random.split(key, 3)
    gamma = 1.0 + 0.1 * jax.random.normal(k1, (4 * dim,), jnp.float32)  # norm.weight
    beta = 0.1 * jax.random.normal(k2, (4 * dim,), jnp.float32)         # norm.bias
    w = 0.05 * jax.random.normal(k3, (dim, 4 * dim), jnp.float32)       # reduction.weight
    return gamma, beta, w


def pack_params(gamma, beta, w):
    return {
        "gamma": gamma.reshape(1, -1),               # (1, 4C) f32
        "beta": beta.reshape(1, -1),                 # (1, 4C) f32
        "w_t": w.T.astype(jnp.bfloat16),             # (4C, C) bf16 for x @ W.T
    }


if __name__ == "__main__":
    key = jax.random.PRNGKey(0)
    kx, kp = jax.random.split(key)

    B, C, H, W = 2, 32, 16, 16
    x = jax.random.normal(kx, (B, C, H, W), jnp.float32)
    gamma, beta, w = init_params(kp, C)
    params = pack_params(gamma, beta, w)

    out = jax.jit(first_patch_merging_forward)(x, params)
    out = jax.block_until_ready(out)

    ref = first_patch_merging_reference(x, gamma, beta, w)
    assert out.shape == (B, C, H // 2, W // 2), out.shape
    err = float(jnp.max(jnp.abs(out - ref)))
    # bf16 matmul / bf16 merged activation vs f32 reference -> loosened tolerance.
    assert jnp.allclose(out, ref, atol=3e-2, rtol=3e-2), f"max abs err {err}"

    print("KERNEL_OK")
</pallas_src>

<mosaic_0001>
module attributes {stable_mosaic.version = 11 : i64} {
  func.func @_norm_reduce_kernel(%arg0: i32, %arg1: memref<128x128xbf16, #tpu.memory_space<vmem>>, %arg2: memref<1x128xf32, #tpu.memory_space<vmem>>, %arg3: memref<1x128xf32, #tpu.memory_space<vmem>>, %arg4: memref<128x32xbf16, #tpu.memory_space<vmem>>, %arg5: memref<128x32xf32, #tpu.memory_space<vmem>>) attributes {dimension_semantics = [#tpu.dimension_semantics<parallel>], iteration_bounds = array<i64: 1>, scalar_prefetch = 0 : i64, scratch_operands = 0 : i64, tpu.core_type = #tpu.core_type<tc>, window_params = [{transform_indices = @transform_0, window_bounds = array<i64: 128, 128>}, {pipeline_mode = #tpu.pipeline_mode<synchronous>, transform_indices = @transform_1, window_bounds = array<i64: 1, 128>}, {pipeline_mode = #tpu.pipeline_mode<synchronous>, transform_indices = @transform_2, window_bounds = array<i64: 1, 128>}, {pipeline_mode = #tpu.pipeline_mode<synchronous>, transform_indices = @transform_3, window_bounds = array<i64: 128, 32>}, {transform_indices = @transform_4, window_bounds = array<i64: 128, 32>}]} {
    %c0 = arith.constant 0 : index
    %c0_0 = arith.constant 0 : index
    %0 = vector.load %arg1[%c0, %c0_0] : memref<128x128xbf16, #tpu.memory_space<vmem>>, vector<128x128xbf16>
    %1 = arith.extf %0 : vector<128x128xbf16> to vector<128x128xf32>
    %cst = arith.constant dense<0.000000e+00> : vector<128xf32>
    %2 = vector.multi_reduction <add>, %1, %cst [1] : vector<128x128xf32> to vector<128xf32>
    %3 = vector.shape_cast %2 : vector<128xf32> to vector<128x1xf32>
    %cst_1 = arith.constant 1.280000e+02 : f32
    %4 = vector.broadcast %cst_1 : f32 to vector<128x1xf32>
    %5 = arith.divf %3, %4 : vector<128x1xf32>
    %6 = vector.broadcast %5 : vector<128x1xf32> to vector<128x128xf32>
    %7 = arith.subf %1, %6 : vector<128x128xf32>
    %8 = arith.mulf %7, %7 : vector<128x128xf32>
    %cst_2 = arith.constant dense<0.000000e+00> : vector<128xf32>
    %9 = vector.multi_reduction <add>, %8, %cst_2 [1] : vector<128x128xf32> to vector<128xf32>
    %10 = vector.shape_cast %9 : vector<128xf32> to vector<128x1xf32>
    %cst_3 = arith.constant 1.280000e+02 : f32
    %11 = vector.broadcast %cst_3 : f32 to vector<128x1xf32>
    %12 = arith.divf %10, %11 : vector<128x1xf32>
    %cst_4 = arith.constant 9.99999974E-6 : f32
    %13 = vector.broadcast %cst_4 : f32 to vector<128x1xf32>
    %14 = arith.addf %12, %13 : vector<128x1xf32>
    %15 = math.rsqrt %14 : vector<128x1xf32>
    %16 = vector.broadcast %15 : vector<128x1xf32> to vector<128x128xf32>
    %17 = arith.mulf %7, %16 : vector<128x128xf32>
    %c0_5 = arith.constant 0 : index
    %c0_6 = arith.constant 0 : index
    %18 = vector.load %arg2[%c0_5, %c0_6] : memref<1x128xf32, #tpu.memory_space<vmem>>, vector<1x128xf32>
    %19 = vector.broadcast %18 : vector<1x128xf32> to vector<128x128xf32>
    %20 = arith.mulf %17, %19 : vector<128x128xf32>
    %c0_7 = arith.constant 0 : index
    %c0_8 = arith.constant 0 : index
    %21 = vector.load %arg3[%c0_7, %c0_8] : memref<1x128xf32, #tpu.memory_space<vmem>>, vector<1x128xf32>
    %22 = vector.broadcast %21 : vector<1x128xf32> to vector<128x128xf32>
    %23 = arith.addf %20, %22 : vector<128x128xf32>
    %24 = arith.truncf %23 : vector<128x128xf32> to vector<128x128xbf16>
    %c0_9 = arith.constant 0 : index
    %c0_10 = arith.constant 0 : index
    %25 = vector.load %arg4[%c0_9, %c0_10] : memref<128x32xbf16, #tpu.memory_space<vmem>>, vector<128x32xbf16>
    %cst_11 = arith.constant dense<0.000000e+00> : vector<128x32xf32>
    %26 = tpu.matmul %24, %25, %cst_11 {dimension_numbers = #tpu.dot_dimension_numbers<[1], [0], [0], [1], [0, 0, 1, 1], [], []>} : vector<128x128xbf16>, vector<128x32xbf16>, vector<128x32xf32> -> vector<128x32xf32>
    %c0_12 = arith.constant 0 : index
    %c0_13 = arith.constant 0 : index
    %27 = vector.load %arg5[%c0_12, %c0_13] : memref<128x32xf32, #tpu.memory_space<vmem>>, vector<128x32xf32>
    tpu.vector_store %arg5[%c0_12, %c0_13], %26 {strides = array<i32>} : memref<128x32xf32, #tpu.memory_space<vmem>>, vector<128x32xf32>,
    return
  }
  func.func @transform_0(%arg0: i32) -> (i32, i32) {
    %c0_i32 = arith.constant 0 : i32
    %c0_i32_0 = arith.constant 0 : i32
    return %arg0, %c0_i32 : i32, i32
  }
  func.func @transform_1(%arg0: i32) -> (i32, i32) {
    %c0_i32 = arith.constant 0 : i32
    %c0_i32_0 = arith.constant 0 : i32
    %c0_i32_1 = arith.constant 0 : i32
    return %c0_i32, %c0_i32_0 : i32, i32
  }
  func.func @transform_2(%arg0: i32) -> (i32, i32) {
    %c0_i32 = arith.constant 0 : i32
    %c0_i32_0 = arith.constant 0 : i32
    %c0_i32_1 = arith.constant 0 : i32
    return %c0_i32, %c0_i32_0 : i32, i32
  }
  func.func @transform_3(%arg0: i32) -> (i32, i32) {
    %c0_i32 = arith.constant 0 : i32
    %c0_i32_0 = arith.constant 0 : i32
    %c0_i32_1 = arith.constant 0 : i32
    return %c0_i32, %c0_i32_0 : i32, i32
  }
  func.func @transform_4(%arg0: i32) -> (i32, i32) {
    %c0_i32 = arith.constant 0 : i32
    %c0_i32_0 = arith.constant 0 : i32
    return %arg0, %c0_i32 : i32, i32
  }
}

</mosaic_0001>

<bundles_post_ra>
// kernel: first_patch_merging_forward.1
= control target key start
LH: loop header
LB: loop body
LE: loop exit
PB: predicated region body
PF: predicated region fallthrough
CT: control target
= control target key end

     0   :  { %s922_s0 = inlined_call_operand.vmem [shape: bf16[128,128], index: 0, kind: input, shape index: {}]   ;;  %s923_s1 = inlined_call_operand.vmem [shape: f32[1,128], index: 1, kind: input, shape index: {}]   ;;  %s924_s2 = inlined_call_operand.vmem [shape: f32[1,128], index: 2, kind: input, shape index: {}]   ;;  %s925_s3 = inlined_call_operand.vmem [shape: bf16[128,32], index: 3, kind: input, shape index: {}]   ;;  %s926_s4 = inlined_call_operand.hbm [shape: f32[128,32], index: 4, kind: output, shape index: {}]  }
   0x1   :  { %v487_v0 = vld [vmem:[%s922_s0] sm:$0xff]   ;;  %v518_v4 = vld [vmem:[%s922_s0 + $0x8] sm:$0xff]  }
   0x2   :  { %v521_v1 = vld [vmem:[%s922_s0 + $0x20] sm:$0xff]   ;;  %v488_v2 = vunpack.c.l.bf16 %v487_v0  ;;  %v489_v5 = vunpack.c.h.bf16 %v487_v0  ;;  %v492_v7 = vunpack.c.l.bf16 %v518_v4  ;;  %v493_v8 = vunpack.c.h.bf16 %v518_v4  ;;  %v522_v9 = vld [vmem:[%s922_s0 + $0x28] sm:$0xff]  }
   0x3   :  { %v504_v3 = vunpack.c.l.bf16 %v521_v1  ;;  %v505_v6 = vunpack.c.h.bf16 %v521_v1 }
   0x4   :  { %51 = vadd.xlane.f32.xlu0 %v488_v2 }
   0x5   :  { %67 = vadd.xlane.f32.xlu1 %v504_v3 }
   0x8   :  { %53 = vadd.xlane.f32.xlu0 %v489_v5 }
   0x9   :  { %69 = vadd.xlane.f32.xlu1 %v505_v6 }
   0xa   :  { %9 = vsyncpa [#allocation3], 0  ;;  %v508_v10 = vunpack.c.l.bf16 %v522_v9  ;;  %v509_v11 = vunpack.c.h.bf16 %v522_v9  ;;  %v699_v12 = vld [vmem:[%s922_s0 + $0x10] sm:$0xff]   ;;  %v713_v18 = vld [vmem:[%s922_s0 + $0x18] sm:$0xff]   ;;  %vm443_vm0 = vcmask 261120  }
   0xb   :  { %v496_v13 = vunpack.c.l.bf16 %v699_v12  ;;  %v497_v14 = vunpack.c.h.bf16 %v699_v12  ;;  %v706_v15 = vld [vmem:[%s922_s0 + $0x30] sm:$0xff]   ;;  %v500_v19 = vunpack.c.l.bf16 %v713_v18  ;;  %v501_v20 = vunpack.c.h.bf16 %v713_v18  ;;  %v724_v21 = vld [vmem:[%s922_s0 + $0x38] sm:$0xff]  }
   0xc   :  { %55 = vadd.xlane.f32.xlu0 %v492_v7  ;;  %v512_v16 = vunpack.c.l.bf16 %v706_v15  ;;  %v513_v17 = vunpack.c.h.bf16 %v706_v15  ;;  %v516_v22 = vunpack.c.l.bf16 %v724_v21  ;;  %v517_v23 = vunpack.c.h.bf16 %v724_v21  ;;  %v593_v15 = vld [vmem:[%s925_s3 + $0x8] sm:$0xff]  }
   0xd   :  { %57 = vadd.xlane.f32.xlu1 %v493_v8 }
  0x10   :  { %71 = vadd.xlane.f32.xlu0 %v508_v10 }
  0x11   :  { %73 = vadd.xlane.f32.xlu1 %v509_v11 }
  0x14   :  { %59 = vadd.xlane.f32.xlu0 %v496_v13 }
  0x15   :  { %61 = vadd.xlane.f32.xlu1 %v497_v14 }
  0x18   :  { %75 = vadd.xlane.f32.xlu0 %v512_v16 }
  0x19   :  { %77 = vadd.xlane.f32.xlu1 %v513_v17 }
  0x1c   :  { %63 = vadd.xlane.f32.xlu0 %v500_v19 }
  0x1d   :  { %65 = vadd.xlane.f32.xlu1 %v501_v20 }
  0x20   :  { %79 = vadd.xlane.f32.xlu0 %v516_v22 }
  0x21   :  { %81 = vadd.xlane.f32.xlu1 %v517_v23 }
  0x91   :  { %v52_v24 = vpop.xlane.xlu0 %51 }
  0x92   :  { %v68_v25 = vpop.xlane.xlu1 %67  ;;  %v84_v26 = vmul.f32 0.0078125, %v52_v24 }
  0x93   :  { %v92_v27 = vmul.f32 0.0078125, %v68_v25 }
  0x94   :  { %v736_v28 = vsub.f32 %v488_v2, %v84_v26 }
  0x95   :  { %v738_v29 = vsub.f32 %v504_v3, %v92_v27  ;;  %v54_v30 = vpop.xlane.xlu0 %53  ;;  %v592_v3 = vld [vmem:[%s925_s3] sm:$0xff]   ;;  %v594_v27 = vld [vmem:[%s925_s3 + $0x10] sm:$0xff]  }
  0x96   :  { %v70_v31 = vpop.xlane.xlu1 %69  ;;  %v85_v32 = vmul.f32 0.0078125, %v54_v30  ;;  %v116_v33 = vmul.f32 %v736_v28, %v736_v28  ;;  %541 = vmatprep.subr.bf16.mxu0 %v592_v3  ;;  %573 = vmatprep.subr.bf16.mxu1 %v592_v3 }
  0x97   :  { %v93_v34 = vmul.f32 0.0078125, %v70_v31  ;;  %v124_v37 = vmul.f32 %v738_v29, %v738_v29  ;;  %542 = vmatpush3.bf16.msra.mxu0 %v592_v3  ;;  %581 = vmatpush3.bf16.msra.mxu1 %v592_v3  ;;  %v597_v31 = vld [vmem:[%s925_s3 + $0x28] sm:$0xff]  }
  0x98   :  { %v742_v35 = vsub.f32 %v489_v5, %v85_v32  ;;  %132 = vadd.xlane.f32.xlu0 %v116_v33  ;;  %543 = vmatprep.subr.bf16.mxu0 %v593_v15  ;;  %v598_v32 = vld [vmem:[%s925_s3 + $0x30] sm:$0xff]   ;;  %v599_v33 = vld [vmem:[%s925_s3 + $0x38] sm:$0xff]  }
  0x99   :  { %v744_v36 = vsub.f32 %v505_v6, %v93_v34  ;;  %v56_v38 = vpop.xlane.xlu0 %55  ;;  %574 = vmatprep.subr.bf16.mxu1 %v593_v15 }
  0x9a   :  { %v58_v39 = vpop.xlane.xlu1 %57  ;;  %v86_v40 = vmul.f32 0.0078125, %v56_v38  ;;  %v117_v41 = vmul.f32 %v742_v35, %v742_v35 }
  0x9b   :  { %v87_v42 = vmul.f32 0.0078125, %v58_v39  ;;  %v125_v45 = vmul.f32 %v744_v36, %v744_v36  ;;  %544 = vmatpush3.bf16.msra.mxu0 %v593_v15  ;;  %582 = vmatpush3.bf16.msra.mxu1 %v593_v15 }
  0x9c   :  { %v750_v43 = vsub.f32 %v492_v7, %v86_v40  ;;  %148 = vadd.xlane.f32.xlu0 %v124_v37  ;;  %134 = vadd.xlane.f32.xlu1 %v117_v41 }
  0x9d   :  { %v752_v44 = vsub.f32 %v493_v8, %v87_v42  ;;  %v72_v46 = vpop.xlane.xlu0 %71  ;;  %545 = vmatprep.subr.bf16.mxu0 %v594_v27  ;;  %575 = vmatprep.subr.bf16.mxu1 %v594_v27 }
  0x9e   :  { %v74_v47 = vpop.xlane.xlu1 %73  ;;  %v94_v48 = vmul.f32 0.0078125, %v72_v46  ;;  %v118_v49 = vmul.f32 %v750_v43, %v750_v43 }
  0x9f   :  { %v95_v50 = vmul.f32 0.0078125, %v74_v47  ;;  %v119_v53 = vmul.f32 %v752_v44, %v752_v44  ;;  %546 = vmatpush3.bf16.msra.mxu0 %v594_v27  ;;  %583 = vmatpush3.bf16.msra.mxu1 %v594_v27 }
  0xa0   :  { %v758_v51 = vsub.f32 %v508_v10, %v94_v48  ;;  %150 = vadd.xlane.f32.xlu1 %v125_v45  ;;  %136 = vadd.xlane.f32.xlu0 %v118_v49 }
  0xa1   :  { %v760_v52 = vsub.f32 %v509_v11, %v95_v50  ;;  %v60_v54 = vpop.xlane.xlu0 %59 }
  0xa2   :  { %v62_v55 = vpop.xlane.xlu1 %61  ;;  %v88_v56 = vmul.f32 0.0078125, %v60_v54  ;;  %v126_v57 = vmul.f32 %v758_v51, %v758_v51 }
  0xa3   :  { %v89_v58 = vmul.f32 0.0078125, %v62_v55  ;;  %v127_v61 = vmul.f32 %v760_v52, %v760_v52 }
  0xa4   :  { %v766_v59 = vsub.f32 %v496_v13, %v88_v56  ;;  %138 = vadd.xlane.f32.xlu1 %v119_v53  ;;  %152 = vadd.xlane.f32.xlu0 %v126_v57 }
  0xa5   :  { %v768_v60 = vsub.f32 %v497_v14, %v89_v58  ;;  %v76_v62 = vpop.xlane.xlu0 %75 }
  0xa6   :  { %v78_v63 = vpop.xlane.xlu1 %77  ;;  %v96_v0 = vmul.f32 0.0078125, %v76_v62  ;;  %v120_v1 = vmul.f32 %v766_v59, %v766_v59 }
  0xa7   :  { %v97_v2 = vmul.f32 0.0078125, %v78_v63  ;;  %v121_v6 = vmul.f32 %v768_v60, %v768_v60 }
  0xa8   :  { %v779_v4 = vsub.f32 %v512_v16, %v96_v0  ;;  %154 = vadd.xlane.f32.xlu1 %v127_v61  ;;  %140 = vadd.xlane.f32.xlu0 %v120_v1 }
  0xa9   :  { %v783_v5 = vsub.f32 %v513_v17, %v97_v2  ;;  %v64_v7 = vpop.xlane.xlu0 %63 }
  0xaa   :  { %v66_v8 = vpop.xlane.xlu1 %65  ;;  %v90_v9 = vmul.f32 0.0078125, %v64_v7  ;;  %v128_v10 = vmul.f32 %v779_v4, %v779_v4  ;;  %v840_v7 = vld [vmem:[%s923_s1] ss:$0 sm:$0xff]  ;;  %s656_s1 = smov [#allocation2]  }
  0xab   :  { %v91_v11 = vmul.f32 0.0078125, %v66_v8  ;;  %v129_v14 = vmul.f32 %v783_v5, %v783_v5 }
  0xac   :  { %v791_v12 = vsub.f32 %v500_v19, %v90_v9  ;;  %142 = vadd.xlane.f32.xlu1 %v121_v6  ;;  %156 = vadd.xlane.f32.xlu0 %v128_v10 }
  0xad   :  { %v795_v13 = vsub.f32 %v501_v20, %v91_v11  ;;  %v80_v16 = vpop.xlane.xlu0 %79 }
  0xae   :  { %v82_v17 = vpop.xlane.xlu1 %81  ;;  %v98_v24 = vmul.f32 0.0078125, %v80_v16  ;;  %v122_v19 = vmul.f32 %v791_v12, %v791_v12 }
  0xaf   :  { %v99_v25 = vmul.f32 0.0078125, %v82_v17  ;;  %v123_v26 = vmul.f32 %v795_v13, %v795_v13 }
  0xb0   :  { %v806_v18 = vsub.f32 %v516_v22, %v98_v24  ;;  %158 = vadd.xlane.f32.xlu1 %v129_v14  ;;  %144 = vadd.xlane.f32.xlu0 %v122_v19  ;;  %v595_v22 = vld [vmem:[%s925_s3 + $0x18] sm:$0xff]   ;;  %v847_v19 = vld [vmem:[%s924_s2] ss:$0 sm:$0xff]  ;;  %s465_s2 = sshll.u32 %s656_s1, 4  ;;  %s466_s2 = int_to_ptr.vmem [resolvable:$true] %s465_s2 }
  0xb1   :  { %v810_v20 = vsub.f32 %v517_v23, %v99_v25  ;;  %547 = vmatprep.subr.bf16.mxu0 %v595_v22  ;;  %576 = vmatprep.subr.bf16.mxu1 %v595_v22  ;;  %v596_v23 = vld [vmem:[%s925_s3 + $0x20] sm:$0xff]   ;;  %s632_s23 = scalar_lea.vmem %s466_s2, 2048  ;;  %p637_p1 = scmp.lt.s32.totalorder %s466_s2, %s466_s2 }
  0xb2   :  { %v130_v30 = vmul.f32 %v806_v18, %v806_v18  ;;  %548 = vmatpush3.bf16.msra.mxu0 %v595_v22  ;;  %584 = vmatpush3.bf16.msra.mxu1 %v595_v22  ;;  %p633_p0 = scmp.ne.s32.totalorder %s466_s2, %s632_s23  ;;  %p638_p2 = scmp.lt.s32.totalorder %s632_s23, %s632_s23 }
  0xb3   :  { %v131_v21 = vmul.f32 %v810_v20, %v810_v20  ;;  %549 = vmatprep.subr.bf16.mxu0 %v596_v23  ;;  %577 = vmatprep.subr.bf16.mxu1 %v596_v23 }
  0xb4   :  { %146 = vadd.xlane.f32.xlu1 %v123_v26  ;;  %160 = vadd.xlane.f32.xlu0 %v130_v30  ;;  %p639_p3 = por %p638_p2, %p637_p1 }
  0xb6   :  { %550 = vmatpush3.bf16.msra.mxu0 %v596_v23  ;;  %585 = vmatpush3.bf16.msra.mxu1 %v596_v23  ;;  %p640_p4 = pnand %p639_p3, %p633_p0 }
  0xb7   :  { %551 = vmatprep.subr.bf16.mxu0 %v597_v31  ;;  %578 = vmatprep.subr.bf16.mxu1 %v597_v31 }
  0xb8   :  { %162 = vadd.xlane.f32.xlu1 %v131_v21 }
  0xba   :  { %552 = vmatpush3.bf16.msra.mxu0 %v597_v31  ;;  %586 = vmatpush3.bf16.msra.mxu1 %v597_v31 }
  0xbb   :  { %553 = vmatprep.subr.bf16.mxu0 %v598_v32  ;;  %579 = vmatprep.subr.bf16.mxu1 %v598_v32 }
  0xbe   :  { %554 = vmatpush3.bf16.msra.mxu0 %v598_v32  ;;  %587 = vmatpush3.bf16.msra.mxu1 %v598_v32 }
  0xbf   :  { %555 = vmatprep.subr.bf16.mxu0 %v599_v33  ;;  %580 = vmatprep.subr.bf16.mxu1 %v599_v33 }
  0xc2   :  { %556 = vmatpush3.bf16.msra.mxu0 %v599_v33  ;;  %588 = vmatpush3.bf16.msra.mxu1 %v599_v33 }
 0x125   :  { %v133_v34 = vpop.xlane.xlu0 %132 }
 0x126   :  { %v164_v37 = vmul.f32 0.0078125, %v133_v34 }
 0x128   :  { %v180_v38 = vadd.f32 1e-05, %v164_v37 }
 0x129   :  { %v135_v39 = vpop.xlane.xlu1 %134  ;;  %v149_v40 = vpop.xlane.xlu0 %148 }
 0x12a   :  { %600 = vrsqrt.f32 %v180_v38  ;;  %v165_v41 = vmul.f32 0.0078125, %v135_v39  ;;  %v172_v42 = vmul.f32 0.0078125, %v149_v40 }
 0x12c   :  { %v181_v45 = vadd.f32 1e-05, %v165_v41  ;;  %v188_v46 = vadd.f32 1e-05, %v172_v42 }
 0x12d   :  { %v151_v47 = vpop.xlane.xlu1 %150  ;;  %v137_v48 = vpop.xlane.xlu0 %136 }
 0x12e   :  { %602 = vrsqrt.f32 %v181_v45  ;;  %v173_v49 = vmul.f32 0.0078125, %v151_v47  ;;  %v166_v50 = vmul.f32 0.0078125, %v137_v48 }
 0x12f   :  { %604 = vrsqrt.f32 %v188_v46 }
 0x130   :  { %v189_v53 = vadd.f32 1e-05, %v173_v49  ;;  %v182_v54 = vadd.f32 1e-05, %v166_v50 }
 0x131   :  { %v139_v55 = vpop.xlane.xlu1 %138  ;;  %v153_v56 = vpop.xlane.xlu0 %152 }
 0x132   :  { %606 = vrsqrt.f32 %v189_v53  ;;  %v167_v57 = vmul.f32 0.0078125, %v139_v55  ;;  %v174_v58 = vmul.f32 0.0078125, %v153_v56 }
 0x133   :  { %608 = vrsqrt.f32 %v182_v54 }
 0x134   :  { %v601_v61 = vpop.eup %600  ;;  %v183_v62 = vadd.f32 1e-05, %v167_v57  ;;  %v190_v63 = vadd.f32 1e-05, %v174_v58 }
 0x135   :  { %v155_v0 = vpop.xlane.xlu1 %154  ;;  %v141_v1 = vpop.xlane.xlu0 %140  ;;  %v212_v2 = vmul.f32 %v601_v61, %v736_v28 }
 0x136   :  { %610 = vrsqrt.f32 %v183_v62  ;;  %v175_v3 = vmul.f32 0.0078125, %v155_v0  ;;  %v168_v6 = vmul.f32 0.0078125, %v141_v1 }
 0x137   :  { %612 = vrsqrt.f32 %v190_v63  ;;  %v235_v17 = vmul.f32 %v840_v7, %v212_v2 }
 0x138   :  { %v603_v8 = vpop.eup %602  ;;  %v191_v9 = vadd.f32 1e-05, %v175_v3  ;;  %v184_v10 = vadd.f32 1e-05, %v168_v6 }
 0x139   :  { %v605_v11 = vpop.eup %604  ;;  %v143_v14 = vpop.xlane.xlu1 %142  ;;  %v213_v16 = vmul.f32 %v603_v8, %v742_v35  ;;  %v258_v31 = vadd.f32 %v847_v19, %v235_v17 }
 0x13a   :  { %v157_v15 = vpop.xlane.xlu0 %156  ;;  %614 = vrsqrt.f32 %v191_v9  ;;  %v169_v28 = vmul.f32 0.0078125, %v143_v14  ;;  %v220_v25 = vmul.f32 %v605_v11, %v738_v29 }
 0x13b   :  { %v176_v24 = vmul.f32 0.0078125, %v157_v15  ;;  %616 = vrsqrt.f32 %v184_v10  ;;  %v236_v26 = vmul.f32 %v840_v7, %v213_v16 }
 0x13c   :  { %v607_v27 = vpop.eup %606  ;;  %v185_v30 = vadd.f32 1e-05, %v169_v28  ;;  %v243_v34 = vmul.f32 %v840_v7, %v220_v25 }
 0x13d   :  { %v192_v21 = vadd.f32 1e-05, %v176_v24  ;;  %v609_v22 = vpop.eup %608  ;;  %v159_v35 = vpop.xlane.xlu1 %158  ;;  %v259_v32 = vadd.f32 %v847_v19, %v236_v26  ;;  %v221_v33 = vmul.f32 %v607_v27, %v744_v36 }
 0x13e   :  { %v145_v23 = vpop.xlane.xlu0 %144  ;;  %618 = vrsqrt.f32 %v185_v30  ;;  %v177_v37 = vmul.f32 0.0078125, %v159_v35  ;;  %v214_v40 = vmul.f32 %v609_v22, %v750_v43  ;;  %v266_v36 = vadd.f32 %v847_v19, %v243_v34 }
 0x13f   :  { %v170_v29 = vmul.f32 0.0078125, %v145_v23  ;;  %620 = vrsqrt.f32 %v192_v21  ;;  %v274_v38 = vpack.c.bf16 %v259_v32, %v258_v31  ;;  %v244_v39 = vmul.f32 %v840_v7, %v221_v33 }
 0x140   :  { %v611_v41 = vpop.eup %610  ;;  %v193_v42 = vadd.f32 1e-05, %v177_v37  ;;  %v237_v53 = vmul.f32 %v840_v7, %v214_v40 }
 0x141   :  { %v186_v45 = vadd.f32 1e-05, %v170_v29  ;;  %v613_v46 = vpop.eup %612  ;;  %v147_v47 = vpop.xlane.xlu1 %146  ;;  %557 = vmatprep.mubr.bf16.mxu0 %v274_v38  ;;  %v267_v49 = vadd.f32 %v847_v19, %v244_v39  ;;  %v215_v50 = vmul.f32 %v611_v41, %v752_v44 }
 0x142   :  { %v161_v48 = vpop.xlane.xlu0 %160  ;;  %622 = vrsqrt.f32 %v193_v42  ;;  %v171_v54 = vmul.f32 0.0078125, %v147_v47  ;;  %v222_v43 = vmul.f32 %v613_v46, %v758_v51  ;;  %v260_v1 = vadd.f32 %v847_v19, %v237_v53 }
 0x143   :  { %v178_v55 = vmul.f32 0.0078125, %v161_v48  ;;  %624 = vrsqrt.f32 %v186_v45  ;;  %v278_v56 = vpack.c.bf16 %v267_v49, %v266_v36  ;;  %v238_v57 = vmul.f32 %v840_v7, %v215_v50 }
 0x144   :  { %v615_v58 = vpop.eup %614  ;;  %v187_v61 = vadd.f32 1e-05, %v171_v54  ;;  %v245_v3 = vmul.f32 %v840_v7, %v222_v43 }
 0x145   :  { %v194_v62 = vadd.f32 1e-05, %v178_v55  ;;  %v617_v63 = vpop.eup %616  ;;  %v163_v0 = vpop.xlane.xlu1 %162  ;;  %565 = vmatprep.mubr.bf16.mxu1 %v278_v56  ;;  %v261_v44 = vadd.f32 %v847_v19, %v238_v57  ;;  %v223_v2 = vmul.f32 %v615_v58, %v760_v52 }
 0x146   :  { %626 = vrsqrt.f32 %v187_v61  ;;  %v179_v51 = vmul.f32 0.0078125, %v163_v0  ;;  %v216_v6 = vmul.f32 %v617_v63, %v766_v59  ;;  %v268_v15 = vadd.f32 %v847_v19, %v245_v3 }
 0x147   :  { %628 = vrsqrt.f32 %v194_v62  ;;  %v275_v8 = vpack.c.bf16 %v261_v44, %v260_v1  ;;  %v246_v9 = vmul.f32 %v840_v7, %v223_v2 }
 0x148   :  { %v619_v10 = vpop.eup %618  ;;  %v195_v11 = vadd.f32 1e-05, %v179_v51  ;;  %v239_v17 = vmul.f32 %v840_v7, %v216_v6 }
 0x149   :  { %v621_v14 = vpop.eup %620  ;;  %558 = vmatmul.mubr.bf16.vlgmr.msra.gmra.mrb[0].mxu0 %v275_v8  ;;  %v269_v16 = vadd.f32 %v847_v19, %v246_v9  ;;  %v217_v52 = vmul.f32 %v619_v10, %v768_v60 }
 0x14a   :  { %630 = vrsqrt.f32 %v195_v11  ;;  %v224_v28 = vmul.f32 %v621_v14, %v779_v4  ;;  %v262_v27 = vadd.f32 %v847_v19, %v239_v17 }
 0x14b   :  { %v279_v59 = vpack.c.bf16 %v269_v16, %v268_v15  ;;  %v240_v24 = vmul.f32 %v840_v7, %v217_v52 }
 0x14c   :  { %v623_v25 = vpop.eup %622  ;;  %v247_v22 = vmul.f32 %v840_v7, %v224_v28 }
 0x14d   :  { %v625_v26 = vpop.eup %624  ;;  %566 = vmatmul.mubr.bf16.vlgmr.msra.gmra.mrb[0].mxu1 %v279_v59  ;;  %v263_v30 = vadd.f32 %v847_v19, %v240_v24  ;;  %v225_v21 = vmul.f32 %v623_v25, %v783_v5 }
 0x14e   :  { %v218_v60 = vmul.f32 %v625_v26, %v791_v12  ;;  %v270_v32 = vadd.f32 %v847_v19, %v247_v22 }
 0x14f   :  { %v276_v35 = vpack.c.bf16 %v263_v30, %v262_v27  ;;  %v248_v23 = vmul.f32 %v840_v7, %v225_v21 }
 0x150   :  { %v627_v4 = vpop.eup %626  ;;  %v241_v37 = vmul.f32 %v840_v7, %v218_v60 }
 0x151   :  { %v629_v31 = vpop.eup %628  ;;  %561 = vmatprep.mubr.bf16.mxu0 %v276_v35  ;;  %v271_v33 = vadd.f32 %v847_v19, %v248_v23  ;;  %v219_v34 = vmul.f32 %v627_v4, %v795_v13 }
 0x152   :  { %v226_v5 = vmul.f32 %v629_v31, %v806_v18  ;;  %v264_v39 = vadd.f32 %v847_v19, %v241_v37 }
 0x153   :  { %v280_v29 = vpack.c.bf16 %v271_v33, %v270_v32  ;;  %v242_v38 = vmul.f32 %v840_v7, %v219_v34 }
 0x154   :  { %v631_v12 = vpop.eup %630  ;;  %v249_v42 = vmul.f32 %v840_v7, %v226_v5 }
 0x155   :  { %569 = vmatprep.mubr.bf16.mxu1 %v280_v29  ;;  %v265_v40 = vadd.f32 %v847_v19, %v242_v38  ;;  %v227_v41 = vmul.f32 %v631_v12, %v810_v20 }
 0x156   :  { %v272_v46 = vadd.f32 %v847_v19, %v249_v42 }
 0x157   :  { %v277_v45 = vpack.c.bf16 %v265_v40, %v264_v39  ;;  %v250_v13 = vmul.f32 %v840_v7, %v227_v41 }
 0x159   :  { %562 = vmatmul.mubr.bf16.gmra.mrb[4].mxu0 %v277_v45  ;;  %v273_v18 = vadd.f32 %v847_v19, %v250_v13 }
 0x15b   :  { %v281_v47 = vpack.c.bf16 %v273_v18, %v272_v46 }
 0x15d   :  { %570 = vmatmul.mubr.bf16.gmra.mrb[4].mxu1 %v281_v47 }
 0x21c   :  { %v559_v48 = vpop.f32.mrb[0].mxu0 }
 0x21d   :  { %446 = vst.msk [vmem:[#allocation2 + $0x10] sm:$0xff] %vm443_vm0, %v559_v48  ;;  %v380_v36 = vpop.f32.mrb[1].mxu0 }
 0x21e   :  { %444 = vst.msk [vmem:[#allocation2] sm:$0xff] %vm443_vm0, %v380_v36  ;;  %v560_v20 = vpop.f32.mrb[2].mxu0 }
 0x21f   :  { %447 = vst.msk [vmem:[#allocation2 + $0x18] sm:$0xff] %vm443_vm0, %v560_v20  ;;  %v383_v49 = vpop.f32.mrb[3].mxu0 }
 0x220   :  { %445 = vst.msk [vmem:[#allocation2 + $0x8] sm:$0xff] %vm443_vm0, %v383_v49  ;;  %v567_v7 = vpop.f32.mrb[0].mxu1 }
 0x221   :  { %454 = vst.msk [vmem:[#allocation2 + $0x50] sm:$0xff] %vm443_vm0, %v567_v7  ;;  %v412_v50 = vpop.f32.mrb[1].mxu1 }
 0x222   :  { %452 = vst.msk [vmem:[#allocation2 + $0x40] sm:$0xff] %vm443_vm0, %v412_v50  ;;  %v568_v19 = vpop.f32.mrb[2].mxu1 }
 0x223   :  { %455 = vst.msk [vmem:[#allocation2 + $0x58] sm:$0xff] %vm443_vm0, %v568_v19  ;;  %v415_v53 = vpop.f32.mrb[3].mxu1 }
 0x224   :  { %453 = vst.msk [vmem:[#allocation2 + $0x48] sm:$0xff] %vm443_vm0, %v415_v53 }
 0x22c   :  { %v563_v54 = vpop.f32.mrb[4].mxu0 }
 0x22d   :  { %450 = vst.msk [vmem:[#allocation2 + $0x30] sm:$0xff] %vm443_vm0, %v563_v54  ;;  %v396_v55 = vpop.f32.mrb[5].mxu0 }
 0x22e   :  { %448 = vst.msk [vmem:[#allocation2 + $0x20] sm:$0xff] %vm443_vm0, %v396_v55  ;;  %v564_v43 = vpop.f32.mrb[6].mxu0 }
 0x22f   :  { %451 = vst.msk [vmem:[#allocation2 + $0x38] sm:$0xff] %vm443_vm0, %v564_v43  ;;  %v399_v56 = vpop.f32.mrb[7].mxu0 }
 0x230   :  { %449 = vst.msk [vmem:[#allocation2 + $0x28] sm:$0xff] %vm443_vm0, %v399_v56  ;;  %v571_v57 = vpop.f32.mrb[4].mxu1 }
 0x231   :  { %458 = vst.msk [vmem:[#allocation2 + $0x70] sm:$0xff] %vm443_vm0, %v571_v57  ;;  %v428_v58 = vpop.f32.mrb[5].mxu1 }
 0x232   :  { %456 = vst.msk [vmem:[#allocation2 + $0x60] sm:$0xff] %vm443_vm0, %v428_v58  ;;  %v572_v61 = vpop.f32.mrb[6].mxu1 }
 0x233   :  { %459 = vst.msk [vmem:[#allocation2 + $0x78] sm:$0xff] %vm443_vm0, %v572_v61  ;;  %v431_v62 = vpop.f32.mrb[7].mxu1 }
 0x234   :  { %457 = vst.msk [vmem:[#allocation2 + $0x68] sm:$0xff] %vm443_vm0, %v431_v62 }
 0x235   :  { %643 = shalt.err (!%p640_p4)
}
 0x236   :  { %s644_s26 = scalar_lea.hbm %s926_s4, 2048 }
 0x237   :  { %p645_p5 = scmp.ne.s32.totalorder %s926_s4, %s644_s26  ;;  %p648_p6 = scmp.lt.u32.totalorder %s644_s26, %s926_s4 }
 0x239   :  { %p650_p7 = pnand %p648_p6, %p645_p5 }
 0x23b   :  { %653 = shalt.err (!%p650_p7)
}
 0x23c   :  { %s657_s0 = smov 128   ;;  %s658_s5 = smov 8  }
 0x23d   :  { %471 = dma.vmem_to_hbm [thread:$0]  %s466_s2, 2048, %s926_s4, [#allocation3], %s657_s0, %s657_s0, %s658_s5  }
 0x23e   :  { %654 = dma.done.wait [#allocation3], 2048  }
 0x23f   :  { %655 = vsyncadd [#allocation3], 4294965248 }
 0x240   :  { %475 = vsyncpa [#allocation3], 1 }

</bundles_post_ra>
